<compile_context>
chip_gen: v5e
topology: v5e:2x2
jax: 0.10.0
libtpu: 0.0.40
codegen_flags: <defaults>
</compile_context>

<pallas_src>
import jax
import jax.numpy as jnp
from jax import lax
from jax.experimental import pallas as pl
from jax.experimental.pallas import tpu as pltpu


def _proj_kernel(x_ref, w_ref, b_ref, o_ref):
    # One large (T*B, IN) x (IN, 4H) matmul: bf16 operands, f32 accumulation.
    o_ref[...] = (
        jnp.dot(x_ref[...], w_ref[...], preferred_element_type=jnp.float32)
        + b_ref[...]
    ).astype(o_ref.dtype)


def _lstm_kernel(maxlen_ref, lens_ref, g_ref, whh_ref, w1_ref, b1_ref,
                 out_ref, h_sc, c_sc):
    t = pl.program_id(0)
    tc = g_ref.shape[0]          # timesteps per chunk
    hdim = h_sc.shape[1]

    @pl.when(t == 0)
    def _init():
        h_sc[...] = jnp.zeros_like(h_sc)
        c_sc[...] = jnp.zeros_like(c_sc)

    # Skip chunks that lie entirely beyond the longest sequence in the batch.
    @pl.when(t * tc < maxlen_ref[0])
    def _chunk():
        lens = lens_ref[...]     # (B, 1) int32 — hoisted out of the inner loop
        whh = whh_ref[...]       # (H, 4H) bf16 — hoisted out of the inner loop

        def step(s, carry):
            h, c = carry
            t_glob = t * tc + s
            # Input projection already folded into g_ref (incl. both biases);
            # only the recurrent matmul remains per step.
            gates = g_ref[s] + jnp.dot(h.astype(jnp.bfloat16), whh,
                                       preferred_element_type=jnp.float32)
            # PyTorch LSTM gate order: i, f, g, o.  Elementwise math kept f32.
            i_g = jax.nn.sigmoid(gates[:, 0 * hdim:1 * hdim])
            f_g = jax.nn.sigmoid(gates[:, 1 * hdim:2 * hdim])
            g_g = jnp.tanh(gates[:, 2 * hdim:3 * hdim])
            o_g = jax.nn.sigmoid(gates[:, 3 * hdim:4 * hdim])
            c_new = f_g * c + i_g * g_g
            h_new = o_g * jnp.tanh(c_new)
            valid = lens > t_glob            # (B, 1) packed-sequence mask
            return (jnp.where(valid, h_new, h), jnp.where(valid, c_new, c))

        h, c = lax.fori_loop(0, tc, step, (h_sc[...], c_sc[...]), unroll=True)
        h_sc[...] = h
        c_sc[...] = c

    @pl.when(t == pl.num_programs(0) - 1)
    def _final():
        # dropout (eval) is identity; then the final Linear.
        out_ref[...] = (
            jnp.dot(h_sc[...].astype(jnp.bfloat16), w1_ref[...],
                    preferred_element_type=jnp.float32)
            + b1_ref[...]
        ).astype(out_ref.dtype)


def auvi_subnet_forward(x, lengths, params, *, tc=16):
    """x: (B, T, in_size) f32, lengths: (B,) int. Returns (B, out_size) f32."""
    B, T, D = x.shape
    H = params["w_hh"].shape[1]
    G = 4 * H
    O = params["w1"].shape[0]

    Bp = max(8, ((B + 7) // 8) * 8)      # pad batch rows to f32 sublane multiple
    Tp = ((T + tc - 1) // tc) * tc       # pad time to a multiple of the chunk

    # Time-major, padded input (padding is masked out by the length test).
    xt = jnp.zeros((Tp, Bp, D), jnp.float32).at[:T, :B, :].set(
        jnp.transpose(x, (1, 0, 2)))
    lens_p = jnp.zeros((Bp,), jnp.int32).at[:B].set(lengths.astype(jnp.int32))

    # bf16 matmul operands; f32 accumulation inside the kernels.
    wih_t = params["w_ih"].T.astype(jnp.bfloat16)                      # (IN, 4H)
    whh_t = params["w_hh"].T.astype(jnp.bfloat16)                      # (H, 4H)
    bias = (params["b_ih"] + params["b_hh"]).astype(jnp.float32)[None, :]
    w1_t = params["w1"].T.astype(jnp.bfloat16)                         # (H, O)
    b1 = params["b1"].astype(jnp.float32)[None, :]                     # (1, O)

    # --- Phase 1: hoisted input projection over ALL timesteps --------------
    x_flat = xt.reshape(Tp * Bp, D).astype(jnp.bfloat16)
    gates = pl.pallas_call(
        _proj_kernel,
        out_shape=jax.ShapeDtypeStruct((Tp * Bp, G), jnp.float32),
    )(x_flat, wih_t, bias).reshape(Tp, Bp, G)

    # --- Phase 2: chunked recurrence ---------------------------------------
    lens2d = lens_p.reshape(Bp, 1)
    maxlen = jnp.max(lens_p).astype(jnp.int32).reshape(1)

    def _const(shape):
        zeros = (0,) * len(shape)
        return pl.BlockSpec(shape, lambda t, ml: zeros)

    out_p = pl.pallas_call(
        _lstm_kernel,
        out_shape=jax.ShapeDtypeStruct((Bp, O), jnp.float32),
        grid_spec=pltpu.PrefetchScalarGridSpec(
            num_scalar_prefetch=1,                 # max(lengths) lands in SMEM
            grid=(Tp // tc,),
            in_specs=[
                _const((Bp, 1)),                                     # lengths
                pl.BlockSpec((tc, Bp, G), lambda t, ml: (t, 0, 0)),  # gate slab
                _const((H, G)),                                      # W_hh^T
                _const((H, O)),                                      # W_1^T
                _const((1, O)),                                      # b_1
            ],
            out_specs=pl.BlockSpec((Bp, O), lambda t, ml: (0, 0)),
            scratch_shapes=[
                pltpu.VMEM((Bp, H), jnp.float32),   # h carry (f32)
                pltpu.VMEM((Bp, H), jnp.float32),   # c carry (f32)
            ],
        ),
        compiler_params=pltpu.CompilerParams(
            dimension_semantics=("arbitrary",),     # sequential recurrence
            vmem_limit_bytes=32 * 1024 * 1024,      # stays within v7x budget
        ),
    )(maxlen, lens2d, gates, whh_t, w1_t, b1)

    return out_p[:B]


def _reference(x, lengths, params):
    """Pure-JAX f32 reference (lax.scan LSTM with length masking)."""
    B, T, D = x.shape
    H = params["w_hh"].shape[1]

    def step(carry, inp):
        h, c = carry
        x_t, t = inp
        gates = (x_t @ params["w_ih"].T + h @ params["w_hh"].T
                 + params["b_ih"] + params["b_hh"])
        i_g = jax.nn.sigmoid(gates[:, 0 * H:1 * H])
        f_g = jax.nn.sigmoid(gates[:, 1 * H:2 * H])
        g_g = jnp.tanh(gates[:, 2 * H:3 * H])
        o_g = jax.nn.sigmoid(gates[:, 3 * H:4 * H])
        c_new = f_g * c + i_g * g_g
        h_new = o_g * jnp.tanh(c_new)
        m = (lengths > t)[:, None]
        return (jnp.where(m, h_new, h), jnp.where(m, c_new, c)), None

    (h, _), _ = lax.scan(
        step,
        (jnp.zeros((B, H), jnp.float32), jnp.zeros((B, H), jnp.float32)),
        (jnp.transpose(x, (1, 0, 2)), jnp.arange(T)),
    )
    return h @ params["w1"].T + params["b1"]


if __name__ == "__main__":
    B, T, IN, H, OUT = 4, 12, 20, 32, 16   # 4H = 128 -> lane-aligned gate slab

    key = jax.random.PRNGKey(0)
    ks = jax.random.split(key, 8)
    scale = 0.1
    params = {
        "w_ih": scale * jax.random.normal(ks[0], (4 * H, IN), jnp.float32),
        "w_hh": scale * jax.random.normal(ks[1], (4 * H, H), jnp.float32),
        "b_ih": scale * jax.random.normal(ks[2], (4 * H,), jnp.float32),
        "b_hh": scale * jax.random.normal(ks[3], (4 * H,), jnp.float32),
        "w1":   scale * jax.random.normal(ks[4], (OUT, H), jnp.float32),
        "b1":   scale * jax.random.normal(ks[5], (OUT,), jnp.float32),
    }
    x = jax.random.normal(ks[6], (B, T, IN), jnp.float32)
    lengths = jnp.array([12, 7, 9, 3], dtype=jnp.int32)

    # tc=8 -> two chunks, exercising the cross-grid-step h/c carry.
    y = auvi_subnet_forward(x, lengths, params, tc=8)
    y = jax.block_until_ready(y)

    y_ref = _reference(x, lengths, params)
    assert y.shape == (B, OUT)
    err = float(jnp.max(jnp.abs(y - y_ref)))
    # bf16 matmul operands (f32 accumulation) -> relaxed tolerance vs f32 ref.
    assert jnp.allclose(y, y_ref, atol=1e-2, rtol=1e-2), \
        f"mismatch vs reference (max abs err {err})"

    print("KERNEL_OK")
</pallas_src>

<mosaic_0001>
module attributes {stable_mosaic.version = 11 : i64} {
  func.func @_proj_kernel(%arg0: memref<128x20xbf16, #tpu.memory_space<vmem>>, %arg1: memref<20x128xbf16, #tpu.memory_space<vmem>>, %arg2: memref<1x128xf32, #tpu.memory_space<vmem>>, %arg3: memref<128x128xf32, #tpu.memory_space<vmem>>) attributes {dimension_semantics = [], scalar_prefetch = 0 : i64, scratch_operands = 0 : i64, tpu.core_type = #tpu.core_type<tc>} {
    %c0 = arith.constant 0 : index
    %c0_0 = arith.constant 0 : index
    %0 = vector.load %arg0[%c0, %c0_0] : memref<128x20xbf16, #tpu.memory_space<vmem>>, vector<128x20xbf16>
    %c0_1 = arith.constant 0 : index
    %c0_2 = arith.constant 0 : index
    %1 = vector.load %arg1[%c0_1, %c0_2] : memref<20x128xbf16, #tpu.memory_space<vmem>>, vector<20x128xbf16>
    %cst = arith.constant dense<0.000000e+00> : vector<128x128xf32>
    %2 = tpu.matmul %0, %1, %cst {dimension_numbers = #tpu.dot_dimension_numbers<[1], [0], [0], [1], [0, 0, 1, 1], [], []>} : vector<128x20xbf16>, vector<20x128xbf16>, vector<128x128xf32> -> vector<128x128xf32>
    %c0_3 = arith.constant 0 : index
    %c0_4 = arith.constant 0 : index
    %3 = vector.load %arg2[%c0_3, %c0_4] : memref<1x128xf32, #tpu.memory_space<vmem>>, vector<1x128xf32>
    %4 = vector.broadcast %3 : vector<1x128xf32> to vector<128x128xf32>
    %5 = arith.addf %2, %4 : vector<128x128xf32>
    %c0_5 = arith.constant 0 : index
    %c0_6 = arith.constant 0 : index
    %6 = vector.load %arg3[%c0_5, %c0_6] : memref<128x128xf32, #tpu.memory_space<vmem>>, vector<128x128xf32>
    tpu.vector_store %arg3[%c0_5, %c0_6], %5 {strides = array<i32>} : memref<128x128xf32, #tpu.memory_space<vmem>>, vector<128x128xf32>,
    return
  }
}

</mosaic_0001>

<bundles_post_ra>
// kernel: tpu_custom_call.1
= control target key start
LH: loop header
LB: loop body
LE: loop exit
PB: predicated region body
PF: predicated region fallthrough
CT: control target
= control target key end

     0   :  { %vm113_vm0 = vcmask 1041408   ;;  %s356_s0 = inlined_call_operand.vmem [shape: bf16[128,20], index: 0, kind: input, shape index: {}]   ;;  %s357_s1 = inlined_call_operand.vmem [shape: bf16[20,128], index: 1, kind: input, shape index: {}]   ;;  %s358_s2 = inlined_call_operand.vmem [shape: f32[1,128], index: 2, kind: input, shape index: {}]   ;;  %s359_s3 = inlined_call_operand.hbm [shape: f32[128,128], index: 3, kind: output, shape index: {}]  }
   0x1   :  { %v34_v0 = vld [vmem:[%s357_s1 + $0x8] sm:$0x3] }
   0x2   :  { %v84_v1 = vunpack.c.l.b16 %v34_v0 }
   0x4   :  { %v86_v2 = vpack.c.b16 %v84_v1, %v84_v1 }
   0x5   :  { %8 = vsyncpa [#allocation3], 0  ;;  %v252_v4 = vld [vmem:[%s357_s1] sm:$0xff]  ;;  %v246_v6 = vld [vmem:[%s356_s0 + $0x10] sm:$0xff]  ;;  %vm88_vm1 = vcmask 162816   ;;  %s188_s8 = sshll.u32 %s359_s3, 4  ;;  %s189_s8 = int_to_ptr.hbm [resolvable:$true] %s188_s8 }
   0x6   :  { %v115_v3 = vsel %vm113_vm0, %v86_v2, 0  ;;  %v244_v5 = vld [vmem:[%s356_s0] sm:$0xff]  ;;  %v250_v8 = vld [vmem:[%s356_s0 + $0x30] sm:$0xff]  ;;  %v245_v9 = vld [vmem:[%s356_s0 + $0x8] sm:$0xff]  ;;  %s290_s9 = smov 128   ;;  %s291_s10 = smov 8  }
   0x7   :  { %123 = vmatpush.bf16.msra.mxu0 %v115_v3  ;;  %253 = vmatpush.bf16.msra.mxu1 %v115_v3  ;;  %v248_v7 = vld [vmem:[%s356_s0 + $0x20] sm:$0xff]  ;;  %v247_v10 = vld [vmem:[%s356_s0 + $0x18] sm:$0xff]  ;;  %v249_v11 = vld [vmem:[%s356_s0 + $0x28] sm:$0xff] }
   0x8   :  { %254 = vmatpush.bf16.msra.mxu2 %v115_v3  ;;  %255 = vmatpush.bf16.msra.mxu3 %v115_v3  ;;  %v251_v12 = vld [vmem:[%s356_s0 + $0x38] sm:$0xff]  ;;  %v262_v13 = vld [vmem:[%s358_s2] ss:$0 sm:$0xff]  ;;  %s289_s0 = smov [#allocation2]  }
   0x9   :  { %s186_s2 = sshll.u32 %s289_s0, 4  ;;  %s187_s2 = int_to_ptr.vmem [resolvable:$true] %s186_s2 }
   0xb   :  { %124 = vmatpush.bf16.msra.mxu0 %v252_v4  ;;  %256 = vmatpush.bf16.msra.mxu1 %v252_v4 }
   0xc   :  { %257 = vmatpush.bf16.msra.mxu2 %v252_v4  ;;  %258 = vmatpush.bf16.msra.mxu3 %v252_v4 }
   0xe   :  { %236 = vmatmul.msk.bf16.vlgmr.msra.gmra.mxu0 %vm88_vm1, %v244_v5  ;;  %238 = vmatmul.msk.bf16.vlgmr.msra.gmra.mxu1 %vm88_vm1, %v246_v6 }
   0xf   :  { %240 = vmatmul.msk.bf16.vlgmr.msra.gmra.mxu2 %vm88_vm1, %v248_v7  ;;  %242 = vmatmul.msk.bf16.vlgmr.msra.gmra.mxu3 %vm88_vm1, %v250_v8 }
  0x1e   :  { %237 = vmatmul.msk.bf16.gmra.mxu0 %vm88_vm1, %v245_v9  ;;  %239 = vmatmul.msk.bf16.gmra.mxu1 %vm88_vm1, %v247_v10 }
  0x1f   :  { %241 = vmatmul.msk.bf16.gmra.mxu2 %vm88_vm1, %v249_v11  ;;  %243 = vmatmul.msk.bf16.gmra.mxu3 %vm88_vm1, %v251_v12 }
  0x8b   :  { %v126_v14 = vpop.f32.mrf.mxu0  ;;  %v136_v15 = vpop.f32.mrf.mxu1 }
  0x8c   :  { %v127_v16 = vadd.f32 %v262_v13, %v126_v14  ;;  %v137_v17 = vadd.f32 %v262_v13, %v136_v15 }
  0x8e   :  { %166 = vst [vmem:[#allocation2] sm:$0xff] %v127_v16 }
  0x8f   :  { %170 = vst [vmem:[#allocation2 + $0x20] sm:$0xff] %v137_v17 }
  0x92   :  { %v146_v18 = vpop.f32.mrf.mxu2  ;;  %v156_v19 = vpop.f32.mrf.mxu3 }
  0x93   :  { %v147_v20 = vadd.f32 %v262_v13, %v146_v18  ;;  %v157_v21 = vadd.f32 %v262_v13, %v156_v19  ;;  %v128_v22 = vpop.f32.mrf.mxu0  ;;  %v138_v23 = vpop.f32.mrf.mxu1 }
  0x94   :  { %v129_v24 = vadd.f32 %v262_v13, %v128_v22  ;;  %v139_v25 = vadd.f32 %v262_v13, %v138_v23 }
  0x95   :  { %174 = vst [vmem:[#allocation2 + $0x40] sm:$0xff] %v147_v20 }
  0x96   :  { %178 = vst [vmem:[#allocation2 + $0x60] sm:$0xff] %v157_v21 }
  0x97   :  { %167 = vst [vmem:[#allocation2 + $0x8] sm:$0xff] %v129_v24 }
  0x98   :  { %171 = vst [vmem:[#allocation2 + $0x28] sm:$0xff] %v139_v25 }
  0x9a   :  { %v148_v26 = vpop.f32.mrf.mxu2  ;;  %v158_v27 = vpop.f32.mrf.mxu3 }
  0x9b   :  { %v149_v28 = vadd.f32 %v262_v13, %v148_v26  ;;  %v159_v29 = vadd.f32 %v262_v13, %v158_v27  ;;  %v131_v30 = vpop.f32.mrf.mxu0  ;;  %v141_v31 = vpop.f32.mrf.mxu1 }
  0x9c   :  { %v132_v32 = vadd.f32 %v262_v13, %v131_v30  ;;  %v142_v33 = vadd.f32 %v262_v13, %v141_v31 }
  0x9d   :  { %175 = vst [vmem:[#allocation2 + $0x48] sm:$0xff] %v149_v28 }
  0x9e   :  { %179 = vst [vmem:[#allocation2 + $0x68] sm:$0xff] %v159_v29 }
  0x9f   :  { %168 = vst [vmem:[#allocation2 + $0x10] sm:$0xff] %v132_v32 }
  0xa0   :  { %172 = vst [vmem:[#allocation2 + $0x30] sm:$0xff] %v142_v33 }
  0xa2   :  { %v151_v34 = vpop.f32.mrf.mxu2  ;;  %v161_v35 = vpop.f32.mrf.mxu3 }
  0xa3   :  { %v152_v36 = vadd.f32 %v262_v13, %v151_v34  ;;  %v162_v37 = vadd.f32 %v262_v13, %v161_v35  ;;  %v133_v38 = vpop.f32.mrf.mxu0  ;;  %v143_v39 = vpop.f32.mrf.mxu1 }
  0xa4   :  { %v134_v40 = vadd.f32 %v262_v13, %v133_v38  ;;  %v144_v41 = vadd.f32 %v262_v13, %v143_v39 }
  0xa5   :  { %176 = vst [vmem:[#allocation2 + $0x50] sm:$0xff] %v152_v36 }
  0xa6   :  { %180 = vst [vmem:[#allocation2 + $0x70] sm:$0xff] %v162_v37 }
  0xa7   :  { %169 = vst [vmem:[#allocation2 + $0x18] sm:$0xff] %v134_v40 }
  0xa8   :  { %173 = vst [vmem:[#allocation2 + $0x38] sm:$0xff] %v144_v41 }
  0xaa   :  { %v153_v42 = vpop.f32.mrf.mxu2  ;;  %v163_v43 = vpop.f32.mrf.mxu3 }
  0xab   :  { %v154_v44 = vadd.f32 %v262_v13, %v153_v42  ;;  %v164_v45 = vadd.f32 %v262_v13, %v163_v43 }
  0xad   :  { %177 = vst [vmem:[#allocation2 + $0x58] sm:$0xff] %v154_v44 }
  0xae   :  { %181 = vst [vmem:[#allocation2 + $0x78] sm:$0xff] %v164_v45 }
  0xaf   :  { %194 = dma.vmem_to_hbm [thread:$0]  %s187_s2, 2048, %s189_s8, [#allocation3], %s290_s9, %s290_s9, %s291_s10  }
  0xb0   :  { %287 = dma.done.wait [#allocation3], 2048  }
  0xb1   :  { %288 = vsyncadd [#allocation3], 4294965248 }
  0xb2   :  { %199 = vsyncpa [#allocation3], 1 }

</bundles_post_ra>
